<compile_context>
chip_gen: v7x
topology: tpu7x:2x2x1
jax: 0.10.0
libtpu: 0.0.40
codegen_flags: <defaults>
</compile_context>

<pallas_src>
import functools

import jax
import jax.numpy as jnp
from jax.experimental import pallas as pl
from jax.experimental.pallas import tpu as pltpu

_LANE = 128
_SUBLANE = 8


def _round_up(x, m):
    return ((x + m - 1) // m) * m


def _plan(n, cin, cout, s, device_kind, spatial_tile):
    """Pick (spatial tile T, batch block bn, vmem_limit_bytes) for this generation."""
    kind = (device_kind or "").lower()
    if "v7" in kind or "7x" in kind:
        # 64 MiB physical VMEM, ~3.2 TB/s HBM shared by 2 TCs: be aggressive on T.
        target_t = 32768
        vmem_budget = 44 << 20
        default_scoped = 32 << 20
        scoped_cap = 56 << 20
    elif "v6" in kind:
        target_t = 16384
        vmem_budget = 28 << 20          # stay inside 32 MiB default scoped limit
        default_scoped = 32 << 20
        scoped_cap = 96 << 20
    else:  # v5e and unknown: conservative (820 GB/s HBM, 16 MiB default scoped VMEM)
        target_t = 12288
        vmem_budget = 14 << 20
        default_scoped = 16 << 20
        scoped_cap = 96 << 20

    if spatial_tile is not None:        # user-tunable override
        target_t = max(_LANE, _round_up(int(spatial_tile), _LANE))

    cin_pad = _round_up(cin, _SUBLANE)      # 3 -> 8 sublanes
    cout_pad = _round_up(cout, _SUBLANE)
    # double-buffered input+output tile bytes per lane column, f32
    bytes_per_lane = 2 * 4 * (cin_pad + cout_pad)

    t_budget = max(_LANE, (vmem_budget // bytes_per_lane) // _LANE * _LANE)
    t_full = _round_up(s, _LANE)            # whole image in one lane-padded tile
    t = max(_LANE, min(target_t, t_budget, t_full))

    # Megacore balance: prefer >= 4 total grid steps while keeping tiles >= 8K lanes.
    while n * pl.cdiv(s, t) < 4 and t >= 2 * 8192:
        t = _round_up(pl.cdiv(t, 2), _LANE)

    # Small-image path: amortize the ~0.35us per-step overhead by blocking several
    # batch elements per grid step (each image still gets a lane-dense (Cout,T) store),
    # but keep >= 2 grid steps when batch allows so both v7x cores get work.
    bn = 1
    if pl.cdiv(s, t) == 1 and n > 1:
        per_img = t
        bn_cap = min(
            n,
            max(1, (vmem_budget // bytes_per_lane) // per_img),
            max(1, target_t // per_img),
        )
        if bn_cap >= n and n >= 2:
            bn_cap = max(1, n // 2)
        for d in range(min(bn_cap, n), 0, -1):
            if n % d == 0:                  # full batch blocks only (no ragged batch)
                bn = d
                break

    # Planned double-buffered VMEM footprint (+ resident weight, negligible).
    footprint = bytes_per_lane * t * bn + 2 * 4 * cout_pad * _round_up(cin, _LANE)
    vmem_limit = None
    if footprint > int(0.9 * default_scoped):
        vmem_limit = int(min(scoped_cap, _round_up(footprint, 1 << 20) + (8 << 20)))

    return t, bn, vmem_limit


def _from_rgb_kernel(x_ref, w_ref, o_ref):
    # x_ref: (bn, Cin, T) spatial tile, w_ref: (Cout, Cin) full weight,
    # o_ref: (bn, Cout, T) lane-dense output tile.
    w = w_ref[...]
    for i in range(x_ref.shape[0]):         # static small unroll over the batch block
        y = jnp.dot(w, x_ref[i], preferred_element_type=jnp.float32)  # (Cout, T)
        # LeakyReLU(negative_slope=0.1): max(y, 0.1*y) == y if y>=0 else 0.1*y
        o_ref[i] = jnp.maximum(y, 0.1 * y).astype(o_ref.dtype)


@functools.partial(jax.jit, static_argnames=("t", "bn", "vmem_limit"))
def _from_rgb_call(x_nchw, weight, *, t, bn, vmem_limit):
    n, cin, h, w = x_nchw.shape
    cout = weight.shape[0]
    s = h * w

    # Metadata-only views: NCHW -> (N, Cin, S); (Cout, Cin, 1, 1) -> (Cout, Cin)
    x3 = x_nchw.reshape(n, cin, s)
    w_mat = weight.reshape(cout, cin)

    grid = (pl.cdiv(n, bn), pl.cdiv(s, t))

    compiler_kwargs = dict(dimension_semantics=("parallel", "parallel"))
    if vmem_limit is not None:
        compiler_kwargs["vmem_limit_bytes"] = int(vmem_limit)

    out3 = pl.pallas_call(
        _from_rgb_kernel,
        # Output dtype matches input (f32) to preserve PyTorch semantics; switching to
        # bf16 here would halve ~90% of the HBM traffic if the consumer allows it.
        out_shape=jax.ShapeDtypeStruct((n, cout, s), x_nchw.dtype),
        grid_spec=pltpu.PrefetchScalarGridSpec(
            num_scalar_prefetch=0,
            grid=grid,
            in_specs=[
                # (bn, Cin, T): spatial in lanes, Cin (3->8) in sublanes
                pl.BlockSpec((bn, cin, t), lambda b, si: (b, 0, si)),
                # tiny constant weight, resident across the whole grid
                pl.BlockSpec((cout, cin), lambda b, si: (0, 0)),
            ],
            # (bn, Cout, T): lane-dense stores (T multiple of 128)
            out_specs=pl.BlockSpec((bn, cout, t), lambda b, si: (b, 0, si)),
        ),
        compiler_params=pltpu.CompilerParams(**compiler_kwargs),
        cost_estimate=pl.CostEstimate(
            flops=2 * cin * cout * n * s,
            transcendentals=0,
            bytes_accessed=(cin + cout) * n * s * 4 + cout * cin * 4,
        ),
    )(x3, w_mat)

    # (N, Cout, S) -> (N, Cout, H, W): metadata-only
    return out3.reshape(n, cout, h, w)


def from_rgb_forward(x_nchw, weight, *, spatial_tile=None):
    """FromRGB forward.  x_nchw: (N, 3, H, W) f32; weight: (Cout, 3, 1, 1) f32."""
    n, cin, h, w = x_nchw.shape
    cout = weight.shape[0]
    s = h * w
    device_kind = jax.devices()[0].device_kind
    t, bn, vmem_limit = _plan(n, cin, cout, s, device_kind, spatial_tile)
    return _from_rgb_call(x_nchw, weight, t=t, bn=bn, vmem_limit=vmem_limit)


def _reference(x_nchw, weight):
    # Pure-JAX reference of the PyTorch forward (1x1 conv, no bias, LeakyReLU(0.1)).
    cout, cin = weight.shape[0], weight.shape[1]
    w_mat = weight.reshape(cout, cin)
    y = jnp.einsum("nchw,oc->nohw", x_nchw, w_mat)
    return jnp.where(y >= 0, y, 0.1 * y)


if __name__ == "__main__":
    key = jax.random.PRNGKey(0)
    kx, kw, kx2 = jax.random.split(key, 3)

    # Shapes consistent with the module: RGB input, small batch/spatial, Cout=32.
    N, CIN, H, W = 2, 3, 16, 16
    COUT = 32

    x = jax.random.normal(kx, (N, CIN, H, W), dtype=jnp.float32)
    # Deterministic init mimicking torch kaiming-uniform bound 1/sqrt(fan_in)
    bound = 1.0 / jnp.sqrt(jnp.float32(CIN * 1 * 1))
    weight = jax.random.uniform(
        kw, (COUT, CIN, 1, 1), dtype=jnp.float32, minval=-bound, maxval=bound
    )

    out = jax.block_until_ready(from_rgb_forward(x, weight))
    ref = _reference(x, weight)
    assert out.shape == (N, COUT, H, W), out.shape
    assert jnp.allclose(out, ref, atol=1e-5, rtol=1e-5), "mismatch vs reference (small)"

    # Second check: larger image with a forced smaller tile so the multi-step
    # pipelined spatial grid path is exercised regardless of TPU generation.
    H2 = W2 = 128
    x2 = jax.random.normal(kx2, (N, CIN, H2, W2), dtype=jnp.float32)
    out2 = jax.block_until_ready(from_rgb_forward(x2, weight, spatial_tile=4096))
    ref2 = _reference(x2, weight)
    assert out2.shape == (N, COUT, H2, W2), out2.shape
    assert jnp.allclose(out2, ref2, atol=1e-5, rtol=1e-5), "mismatch vs reference (tiled)"

    print("KERNEL_OK")
</pallas_src>

<mosaic_0001>
module attributes {stable_mosaic.version = 11 : i64} {
  func.func @_from_rgb_kernel(%arg0: i32, %arg1: i32, %arg2: memref<1x3x256xf32, #tpu.memory_space<vmem>>, %arg3: memref<32x3xf32, #tpu.memory_space<vmem>>, %arg4: memref<1x32x256xf32, #tpu.memory_space<vmem>>) attributes {dimension_semantics = [#tpu.dimension_semantics<parallel>, #tpu.dimension_semantics<parallel>], iteration_bounds = array<i64: 2, 1>, scalar_prefetch = 0 : i64, scratch_operands = 0 : i64, tpu.core_type = #tpu.core_type<tc>, window_params = [{transform_indices = @transform_0, window_bounds = array<i64: 1, 3, 256>}, {pipeline_mode = #tpu.pipeline_mode<synchronous>, transform_indices = @transform_1, window_bounds = array<i64: 32, 3>}, {transform_indices = @transform_2, window_bounds = array<i64: 1, 32, 256>}]} {
    %c0 = arith.constant 0 : index
    %c0_0 = arith.constant 0 : index
    %0 = vector.load %arg3[%c0, %c0_0] : memref<32x3xf32, #tpu.memory_space<vmem>>, vector<32x3xf32>
    %c0_1 = arith.constant 0 : index
    %c0_2 = arith.constant 0 : index
    %c0_3 = arith.constant 0 : index
    %1 = vector.load %arg2[%c0_1, %c0_2, %c0_3] : memref<1x3x256xf32, #tpu.memory_space<vmem>>, vector<1x3x256xf32>
    %2 = vector.shape_cast %1 : vector<1x3x256xf32> to vector<3x256xf32>
    %cst = arith.constant dense<0.000000e+00> : vector<32x256xf32>
    %3 = tpu.matmul %0, %2, %cst {dimension_numbers = #tpu.dot_dimension_numbers<[1], [0], [0], [1], [0, 0, 1, 1], [], []>} : vector<32x3xf32>, vector<3x256xf32>, vector<32x256xf32> -> vector<32x256xf32>
    %cst_4 = arith.constant 1.000000e-01 : f32
    %4 = vector.broadcast %cst_4 : f32 to vector<32x256xf32>
    %5 = arith.mulf %4, %3 : vector<32x256xf32>
    %6 = arith.maximumf %3, %5 : vector<32x256xf32>
    %c0_5 = arith.constant 0 : index
    %c0_6 = arith.constant 0 : index
    %c0_7 = arith.constant 0 : index
    %7 = vector.load %arg4[%c0_5, %c0_6, %c0_7] : memref<1x32x256xf32, #tpu.memory_space<vmem>>, vector<1x32x256xf32>
    %8 = vector.shape_cast %7 : vector<1x32x256xf32> to vector<32x256xf32>
    %9 = vector.shape_cast %6 : vector<32x256xf32> to vector<1x32x256xf32>
    tpu.vector_store %arg4[%c0_5, %c0_6, %c0_7], %9 {strides = array<i32>} : memref<1x32x256xf32, #tpu.memory_space<vmem>>, vector<1x32x256xf32>,
    return
  }
  func.func @transform_0(%arg0: i32, %arg1: i32) -> (i32, i32, i32) {
    %c0_i32 = arith.constant 0 : i32
    %c0_i32_0 = arith.constant 0 : i32
    return %arg0, %c0_i32, %arg1 : i32, i32, i32
  }
  func.func @transform_1(%arg0: i32, %arg1: i32) -> (i32, i32) {
    %c0_i32 = arith.constant 0 : i32
    %c0_i32_0 = arith.constant 0 : i32
    %c0_i32_1 = arith.constant 0 : i32
    return %c0_i32, %c0_i32_0 : i32, i32
  }
  func.func @transform_2(%arg0: i32, %arg1: i32) -> (i32, i32, i32) {
    %c0_i32 = arith.constant 0 : i32
    %c0_i32_0 = arith.constant 0 : i32
    return %arg0, %c0_i32, %arg1 : i32, i32, i32
  }
}

</mosaic_0001>

<bundles_post_ra>
// kernel: _from_rgb_call.1
= control target key start
LH: loop header
LB: loop body
LE: loop exit
PB: predicated region body
PF: predicated region fallthrough
CT: control target
= control target key end

     0   :  { %s495_s9 = smov 0   ;;  %s497_s10 = smov 0   ;;  %s544_s0 = inlined_call_operand.vmem [shape: f32[2,3,256], index: 0, kind: input, shape index: {}]   ;;  %s545_s1 = inlined_call_operand.vmem [shape: f32[32,3], index: 1, kind: input, shape index: {}]   ;;  %s546_s2 = inlined_call_operand.vmem [shape: f32[2,32,256], index: 2, kind: output, shape index: {}]  }
   0x1   :  { %s499_s11 = smov 0  }
   0x2 LB: > { %s24_s12 = sadd.s32 1, %s473_s10  ;;  %p412_p0 = scmp.ge.s32.totalorder %s477_s11, 1  ;;  %s477_s11 = sphi %s499_s11, %s12_s11   ;;  %s473_s10 = sphi %s497_s10, %s548_s10   ;;  %s469_s9 = sphi %s495_s9, %s547_s9  }
   0x3   : > { %p26_p1 = scmp.ge.s32.totalorder %s24_s12, 2  ;;  %p133_p2 = scmp.lt.s32.totalorder %s477_s11, 3 }
   0x5   : > { %s550_s12 = smov (%p26_p1, %s24_s12), 0  ;;  %p134_p3 = pnand %p412_p0, %p133_p2 }
   0x6   : > { %p164_p4 = scmp.lt.s32.totalorder (!%p134_p3), %s469_s9, 1  ;;  %v479_v0 = vmov (!%p134_p3), 0.0   ;;  %vm203_vm0 = vcmask (!%p134_p3), 1042432   ;;  %v183_v3 = vld [vmem:[%s545_s1] sm:$0xff] (!%p134_p3)  ;;  %vm190_vm1 = vcmask (!%p134_p3), 23552   ;;  %v185_v4 = vld [vmem:[%s545_s1 + $0x10] sm:$0xff] (!%p134_p3) }
   0x7   : > { %137 = sbr.rel (%p134_p3) target bundleno = 245 (0xf5), region = 28  ;;  %272 = vmatprep.mubr.f32.mxu0 (!%p134_p3), %v479_v0  ;;  %284 = vmatprep.mubr.f32.mxu1 (!%p134_p3), %v479_v0  ;;  %v184_v5 = vld [vmem:[%s545_s1 + $0x8] sm:$0xff] (!%p134_p3)  ;;  %v186_v6 = vld [vmem:[%s545_s1 + $0x18] sm:$0xff] (!%p134_p3) }
   0xe   : > { %s552_s9 = smov (!%p164_p4, %s469_s9), 1 }
   0xf   : > { %s425_s13 = sshll.u32 %s552_s9, 3  ;;  %s426_s25 = sshll.u32 %s552_s9, 6 }
  0x10   : > { %s171_s16 = scalar_lea.vmem %s544_s0, %s425_s13  ;;  %s181_s28 = scalar_lea.vmem %s546_s2, %s426_s25 }
  0x11   : > { %v187_v1 = vld [vmem:[%s171_s16] sm:$0x77] }
  0x12   : > { %v189_v2 = vcombine.high %v187_v1, %v187_v1 }
  0x14   : > { %417 = vmatprep.subr.msk.mxu0 %vm203_vm0, %v189_v2  ;;  %427 = vmatprep.subr.msk.mxu1 %vm203_vm0, %v189_v2 }
  0x15   : > { %418 = vmatpush1.msk.msra.mxu0 %vm203_vm0, %v187_v1  ;;  %428 = vmatpush1.msk.msra.mxu1 %vm203_vm0, %v187_v1 }
  0x16   : > { %419 = vmatmul.mubr.msk.f32.vlgmr.msra.gmra.mrb[0].mxu0 %vm190_vm1, %v183_v3  ;;  %421 = vmatmul.mubr.msk.f32.vlgmr.msra.gmra.mrb[0].mxu1 %vm190_vm1, %v185_v4 }
  0x17   : > { %278 = vmatprep.mubr.f32.mxu0 %v479_v0  ;;  %290 = vmatprep.mubr.f32.mxu1 %v479_v0 }
  0x1a   : > { %420 = vmatmul.mubr.msk.f32.gmra.mrb[2].mxu0 %vm190_vm1, %v184_v5  ;;  %422 = vmatmul.mubr.msk.f32.gmra.mrb[2].mxu1 %vm190_vm1, %v186_v6 }
  0xe9   : > { %v274_v7 = vpop.f32.mrb[0].mxu0  ;;  %v286_v8 = vpop.f32.mrb[0].mxu1 }
  0xea   : > { %v297_v9 = vmul.f32 0.1, %v274_v7  ;;  %v301_v10 = vmul.f32 0.1, %v286_v8  ;;  %v276_v11 = vpop.f32.mrb[1].mxu0  ;;  %v288_v12 = vpop.f32.mrb[1].mxu1 }
  0xeb   : > { %v298_v13 = vmul.f32 0.1, %v276_v11  ;;  %v302_v14 = vmul.f32 0.1, %v288_v12 }
  0xec   : > { %v305_v15 = vmax.f32 %v274_v7, %v297_v9  ;;  %v309_v16 = vmax.f32 %v286_v8, %v301_v10 }
  0xed   : > { %v306_v17 = vmax.f32 %v276_v11, %v298_v13  ;;  %v310_v18 = vmax.f32 %v288_v12, %v302_v14  ;;  %v280_v19 = vpop.f32.mrb[2].mxu0  ;;  %v292_v20 = vpop.f32.mrb[2].mxu1 }
  0xee   : > { %313 = vst [vmem:[%s181_s28] sm:$0xff] %v305_v15  ;;  %317 = vst [vmem:[%s181_s28 + $0x20] sm:$0xff] %v309_v16  ;;  %v299_v21 = vmul.f32 0.1, %v280_v19  ;;  %v303_v22 = vmul.f32 0.1, %v292_v20  ;;  %v282_v23 = vpop.f32.mrb[3].mxu0 }
  0xef   : > { %v294_v24 = vpop.f32.mrb[3].mxu1  ;;  %314 = vst [vmem:[%s181_s28 + $0x8] sm:$0xff] %v306_v17  ;;  %318 = vst [vmem:[%s181_s28 + $0x28] sm:$0xff] %v310_v18  ;;  %v300_v25 = vmul.f32 0.1, %v282_v23 }
  0xf0   : > { %v304_v26 = vmul.f32 0.1, %v294_v24  ;;  %v307_v27 = vmax.f32 %v280_v19, %v299_v21  ;;  %v311_v28 = vmax.f32 %v292_v20, %v303_v22 }
  0xf1   : > { %v308_v29 = vmax.f32 %v282_v23, %v300_v25 }
  0xf2   : > { %v312_v30 = vmax.f32 %v294_v24, %v304_v26  ;;  %315 = vst [vmem:[%s181_s28 + $0x10] sm:$0xff] %v307_v27  ;;  %319 = vst [vmem:[%s181_s28 + $0x30] sm:$0xff] %v311_v28 }
  0xf3   : > { %316 = vst [vmem:[%s181_s28 + $0x18] sm:$0xff] %v308_v29 }
  0xf4   : > { %320 = vst [vmem:[%s181_s28 + $0x38] sm:$0xff] %v312_v30 }
  0xf5 PF: > { %s12_s11 = sadd.s32 1, %s477_s11   ;;  %s547_s9 = smov %s473_s10 }
  0xf6   : > { %p9_p5 = scmp.ge.s32.totalorder %s12_s11, 4   ;;  %s548_s10 = smov %s550_s12 }
  0xf8   :  { %11 = sbr.rel (!%p9_p5) target bundleno = 2 (0x2), region = 58 }

</bundles_post_ra>
